<compile_context>
chip_gen: v6e
topology: v6e:2x2x1
jax: 0.10.0
libtpu: 0.0.40
codegen_flags: <defaults>
</compile_context>

<pallas_src>
import functools

import jax
import jax.numpy as jnp
from jax.experimental import pallas as pl
from jax.experimental.pallas import tpu as pltpu


def _round_up(x, m):
    return (x + m - 1) // m * m


# ----------------------------------------------------------------------------
# Kernel 1: one-shot gate.  weights = tanh(W_hat) * sigmoid(M_hat), computed in
# f32 on VPU/EUP (v5e-safe), stored already transposed as (n_in, Np).
# ----------------------------------------------------------------------------
def _nac_gate_kernel(w_hat_ref, m_hat_ref, w_ref):
    w_hat = w_hat_ref[...].astype(jnp.float32)
    m_hat = m_hat_ref[...].astype(jnp.float32)
    gate = jnp.tanh(w_hat) * jax.nn.sigmoid(m_hat)   # values in (-1, 1)
    w_ref[...] = gate.astype(w_ref.dtype)


# ----------------------------------------------------------------------------
# Kernel 2: batch-tiled matmul  out = x @ weights   (weights already (K, N)).
# No in-kernel transpose, no scratch init -> batch axis is "parallel".
# ----------------------------------------------------------------------------
def _nac_matmul_kernel(x_ref, w_ref, o_ref):
    w = w_ref[...]
    x = x_ref[...].astype(w.dtype)
    # f32 path: request full-precision MXU passes (matches F.linear closely).
    prec = jax.lax.Precision.HIGHEST if w.dtype == jnp.float32 else None
    out = jnp.dot(x, w, preferred_element_type=jnp.float32, precision=prec)
    o_ref[...] = out.astype(o_ref.dtype)


def nac_forward(x, w_hat, m_hat, *, batch_tile=1024, use_bf16_matmul=False):
    """NAC forward. x: (B, n_in); w_hat, m_hat: (n_out, n_in)."""
    B, n_in = x.shape
    n_out, n_in2 = w_hat.shape
    assert n_in == n_in2 and m_hat.shape == w_hat.shape

    w_dtype = jnp.bfloat16 if use_bf16_matmul else jnp.float32
    w_bytes = 2 if use_bf16_matmul else 4

    # Output lane dim padded to 128 -> unmasked, lane-dense vst.
    # Padded N columns are tanh(0)*sigmoid(0) = 0 and are sliced away below.
    Np = _round_up(n_out, 128)

    # Pre-transpose + pad only the (tiny) params; x keeps its native K = n_in.
    # Under the caller's jit this transpose/pad fuses into the weight prep.
    w_hat_t = jnp.pad(w_hat.T, ((0, 0), (0, Np - n_out)))   # (n_in, Np)
    m_hat_t = jnp.pad(m_hat.T, ((0, 0), (0, Np - n_out)))

    # ---- prologue: gated weight (single bf16/f32 array fed to the matmul) ----
    gate_cost = pl.CostEstimate(
        flops=n_in * Np,
        transcendentals=2 * n_in * Np,
        bytes_accessed=2 * n_in * Np * 4 + n_in * Np * w_bytes,
    )
    weights = pl.pallas_call(
        _nac_gate_kernel,
        out_shape=jax.ShapeDtypeStruct((n_in, Np), w_dtype),
        cost_estimate=gate_cost,
    )(w_hat_t, m_hat_t)

    # ---- batch-tiled matmul ----
    Bp = _round_up(B, 8)                       # sublane alignment only
    tb = min(_round_up(batch_tile, 16), Bp)    # large tile; 16 feeds bf16 MXU nicely
    grid_b = pl.cdiv(Bp, tb)                   # partial last block allowed (masked)

    xp = jnp.pad(x, ((0, Bp - B), (0, 0))) if Bp != B else x

    mm_cost = pl.CostEstimate(
        flops=2 * Bp * n_in * Np,
        transcendentals=0,
        bytes_accessed=Bp * n_in * 4 + n_in * Np * w_bytes + Bp * Np * 4,
    )

    out = pl.pallas_call(
        _nac_matmul_kernel,
        out_shape=jax.ShapeDtypeStruct((Bp, Np), x.dtype),
        grid=(grid_b,),
        in_specs=[
            # x: batch tile, FULL contraction dim (no 4x lane padding in HBM).
            pl.BlockSpec((tb, n_in), lambda i: (i, 0)),
            # gated weights: same block every step -> stays resident, no re-DMA.
            pl.BlockSpec((n_in, Np), lambda i: (0, 0)),
        ],
        out_specs=pl.BlockSpec((tb, Np), lambda i: (i, 0)),
        compiler_params=pltpu.CompilerParams(
            # No cross-iteration state -> safe to shard the batch grid across
            # both v7x TensorCores.
            dimension_semantics=("parallel",),
        ),
        cost_estimate=mm_cost,
    )(xp, weights)

    return out[:B, :n_out]


def kaiming_uniform(key, shape):
    """Matches torch.nn.init.kaiming_uniform_ defaults (a=0, fan_in mode):
       bound = sqrt(6 / fan_in)."""
    fan_in = shape[1]
    bound = (6.0 / fan_in) ** 0.5
    return jax.random.uniform(key, shape, jnp.float32, -bound, bound)


if __name__ == "__main__":
    key = jax.random.PRNGKey(0)
    k_x, k_w, k_m, k_x2 = jax.random.split(key, 4)

    # Small shapes consistent with the module: batch=8, n_in=32, n_out=16.
    B, n_in, n_out = 8, 32, 16
    x = jax.random.normal(k_x, (B, n_in), jnp.float32)
    w_hat = kaiming_uniform(k_w, (n_out, n_in))
    m_hat = kaiming_uniform(k_m, (n_out, n_in))

    weights_ref = jnp.tanh(w_hat) * jax.nn.sigmoid(m_hat)

    # Jit the wrapper so weight transpose/pad fuses (hoisted out of the kernel
    # launch path), matching how it would be called inside a training step.
    nac_jit = jax.jit(functools.partial(nac_forward))

    # Path 1: single batch tile, f32 matmul (matches F.linear precision).
    out = jax.block_until_ready(nac_jit(x, w_hat, m_hat))
    ref = x @ weights_ref.T
    assert out.shape == (B, n_out)
    assert jnp.allclose(out, ref, atol=1e-3, rtol=1e-3), "mismatch vs reference"

    # Path 2: multi-tile grid with a partial last block (B=300, tile=128),
    # exercising the "parallel" batch axis and resident-weight block.
    B2 = 300
    x2 = jax.random.normal(k_x2, (B2, n_in), jnp.float32)
    nac_tiled = jax.jit(functools.partial(nac_forward, batch_tile=128))
    out2 = jax.block_until_ready(nac_tiled(x2, w_hat, m_hat))
    ref2 = x2 @ weights_ref.T
    assert out2.shape == (B2, n_out)
    assert jnp.allclose(out2, ref2, atol=1e-3, rtol=1e-3), "mismatch (tiled path)"

    # Path 3: optional bf16 weight/matmul mode (halves weight DMA; looser tol).
    nac_bf16 = jax.jit(functools.partial(nac_forward, use_bf16_matmul=True))
    out3 = jax.block_until_ready(nac_bf16(x, w_hat, m_hat))
    assert jnp.allclose(out3, ref, atol=2e-2, rtol=2e-2), "mismatch (bf16 path)"

    print("KERNEL_OK")
</pallas_src>

<mosaic_0001>
module attributes {stable_mosaic.version = 11 : i64} {
  func.func @_nac_gate_kernel(%arg0: memref<32x128xf32, #tpu.memory_space<vmem>>, %arg1: memref<32x128xf32, #tpu.memory_space<vmem>>, %arg2: memref<32x128xf32, #tpu.memory_space<vmem>>) attributes {dimension_semantics = [], scalar_prefetch = 0 : i64, scratch_operands = 0 : i64, tpu.core_type = #tpu.core_type<tc>} {
    %c0 = arith.constant 0 : index
    %c0_0 = arith.constant 0 : index
    %0 = vector.load %arg0[%c0, %c0_0] : memref<32x128xf32, #tpu.memory_space<vmem>>, vector<32x128xf32>
    %c0_1 = arith.constant 0 : index
    %c0_2 = arith.constant 0 : index
    %1 = vector.load %arg1[%c0_1, %c0_2] : memref<32x128xf32, #tpu.memory_space<vmem>>, vector<32x128xf32>
    %2 = math.tanh %0 : vector<32x128xf32>
    %3 = arith.negf %1 : vector<32x128xf32>
    %4 = math.exp %3 : vector<32x128xf32>
    %cst = arith.constant 1.000000e+00 : f32
    %5 = vector.broadcast %cst : f32 to vector<32x128xf32>
    %6 = arith.addf %5, %4 : vector<32x128xf32>
    %7 = arith.divf %5, %6 : vector<32x128xf32>
    %8 = arith.mulf %2, %7 : vector<32x128xf32>
    %c0_3 = arith.constant 0 : index
    %c0_4 = arith.constant 0 : index
    %9 = vector.load %arg2[%c0_3, %c0_4] : memref<32x128xf32, #tpu.memory_space<vmem>>, vector<32x128xf32>
    tpu.vector_store %arg2[%c0_3, %c0_4], %8 {strides = array<i32>} : memref<32x128xf32, #tpu.memory_space<vmem>>, vector<32x128xf32>,
    return
  }
}

module attributes {stable_mosaic.version = 11 : i64} {
  func.func @_nac_matmul_kernel(%arg0: i32, %arg1: memref<8x32xf32, #tpu.memory_space<vmem>>, %arg2: memref<32x128xf32, #tpu.memory_space<vmem>>, %arg3: memref<8x128xf32, #tpu.memory_space<vmem>>) attributes {dimension_semantics = [#tpu.dimension_semantics<parallel>], iteration_bounds = array<i64: 1>, scalar_prefetch = 0 : i64, scratch_operands = 0 : i64, tpu.core_type = #tpu.core_type<tc>, window_params = [{transform_indices = @transform_0, window_bounds = array<i64: 8, 32>}, {pipeline_mode = #tpu.pipeline_mode<synchronous>, transform_indices = @transform_1, window_bounds = array<i64: 32, 128>}, {transform_indices = @transform_2, window_bounds = array<i64: 8, 128>}]} {
    %c0 = arith.constant 0 : index
    %c0_0 = arith.constant 0 : index
    %0 = vector.load %arg2[%c0, %c0_0] : memref<32x128xf32, #tpu.memory_space<vmem>>, vector<32x128xf32>
    %c0_1 = arith.constant 0 : index
    %c0_2 = arith.constant 0 : index
    %1 = vector.load %arg1[%c0_1, %c0_2] : memref<8x32xf32, #tpu.memory_space<vmem>>, vector<8x32xf32>
    %cst = arith.constant dense<0.000000e+00> : vector<8x128xf32>
    %2 = tpu.matmul %1, %0, %cst {dimension_numbers = #tpu.dot_dimension_numbers<[1], [0], [0], [1], [0, 0, 1, 1], [], []>, precision = #tpu.contract_precision<fp32>} : vector<8x32xf32>, vector<32x128xf32>, vector<8x128xf32> -> vector<8x128xf32>
    %c0_3 = arith.constant 0 : index
    %c0_4 = arith.constant 0 : index
    %3 = vector.load %arg3[%c0_3, %c0_4] : memref<8x128xf32, #tpu.memory_space<vmem>>, vector<8x128xf32>
    tpu.vector_store %arg3[%c0_3, %c0_4], %2 {strides = array<i32>} : memref<8x128xf32, #tpu.memory_space<vmem>>, vector<8x128xf32>,
    return
  }
  func.func @transform_0(%arg0: i32) -> (i32, i32) {
    %c0_i32 = arith.constant 0 : i32
    %c0_i32_0 = arith.constant 0 : i32
    return %arg0, %c0_i32 : i32, i32
  }
  func.func @transform_1(%arg0: i32) -> (i32, i32) {
    %c0_i32 = arith.constant 0 : i32
    %c0_i32_0 = arith.constant 0 : i32
    %c0_i32_1 = arith.constant 0 : i32
    return %c0_i32, %c0_i32_0 : i32, i32
  }
  func.func @transform_2(%arg0: i32) -> (i32, i32) {
    %c0_i32 = arith.constant 0 : i32
    %c0_i32_0 = arith.constant 0 : i32
    return %arg0, %c0_i32 : i32, i32
  }
}

</mosaic_0001>

<bundles_post_ra>
// kernel: nac_forward.2
= control target key start
LH: loop header
LB: loop body
LE: loop exit
PB: predicated region body
PF: predicated region fallthrough
CT: control target
= control target key end

     0   :  { %s138_s1 = inlined_call_operand.vmem [shape: f32[32,128], index: 1, kind: input, shape index: {}]   ;;  %s139_s0 = inlined_call_operand.vmem [shape: f32[32,128], index: 0, kind: input, shape index: {}]   ;;  %s140_s2 = inlined_call_operand.vmem [shape: f32[32,128], index: 2, kind: output, shape index: {}]  }
   0x1   :  { %v15_v0 = vld [vmem:[%s138_s1] sm:$0xff]  ;;  %v16_v2 = vld [vmem:[%s138_s1 + $0x8] sm:$0xff]  ;;  %v17_v3 = vld [vmem:[%s138_s1 + $0x10] sm:$0xff] }
   0x2   :  { %v59_v1 = vmul.f32 -1.442695, %v15_v0  ;;  %v60_v4 = vmul.f32 -1.442695, %v16_v2  ;;  %v61_v5 = vmul.f32 -1.442695, %v17_v3 }
   0x3   :  { %v18_v6 = vld [vmem:[%s138_s1 + $0x18] sm:$0xff]  ;;  %v11_v8 = vld [vmem:[%s139_s0] sm:$0xff]  ;;  %v12_v9 = vld [vmem:[%s139_s0 + $0x8] sm:$0xff] }
   0x4   :  { %63 = vpow2.f32 %v59_v1  ;;  %v62_v7 = vmul.f32 -1.442695, %v18_v6  ;;  %v13_v10 = vld [vmem:[%s139_s0 + $0x10] sm:$0xff]  ;;  %v14_v15 = vld [vmem:[%s139_s0 + $0x18] sm:$0xff] }
   0x5   :  { %65 = vpow2.f32 %v60_v4 }
   0x6   :  { %67 = vpow2.f32 %v61_v5 }
   0x7   :  { %69 = vpow2.f32 %v62_v7 }
   0x8   :  { %71 = vtanh.f32 %v11_v8 }
   0x9   :  { %73 = vtanh.f32 %v12_v9 }
   0xa   :  { %75 = vtanh.f32 %v13_v10 }
  0x11   :  { %v64_v11 = vpop.eup %63 }
  0x12   :  { %v66_v12 = vpop.eup %65  ;;  %v35_v13 = vadd.f32 1.0, %v64_v11 }
  0x13   :  { %v36_v14 = vadd.f32 1.0, %v66_v12  ;;  %v68_v16 = vpop.eup %67 }
  0x14   :  { %77 = vrcp.f32 %v35_v13  ;;  %v37_v17 = vadd.f32 1.0, %v68_v16  ;;  %v70_v18 = vpop.eup %69 }
  0x15   :  { %79 = vrcp.f32 %v36_v14  ;;  %v38_v19 = vadd.f32 1.0, %v70_v18  ;;  %v72_v20 = vpop.eup %71 }
  0x16   :  { %81 = vtanh.f32 %v14_v15  ;;  %v74_v21 = vpop.eup %73 }
  0x17   :  { %83 = vrcp.f32 %v37_v17  ;;  %v76_v22 = vpop.eup %75 }
  0x18   :  { %85 = vrcp.f32 %v38_v19 }
  0x21   :  { %v78_v23 = vpop.eup %77 }
  0x22   :  { %v80_v24 = vpop.eup %79  ;;  %v47_v25 = vmul.f32 %v78_v23, %v72_v20 }
  0x23   :  { %v82_v26 = vpop.eup %81  ;;  %v48_v27 = vmul.f32 %v80_v24, %v74_v21 }
  0x24   :  { %v84_v28 = vpop.eup %83  ;;  %51 = vst [vmem:[%s140_s2] sm:$0xff] %v47_v25 }
  0x25   :  { %52 = vst [vmem:[%s140_s2 + $0x8] sm:$0xff] %v48_v27  ;;  %v49_v29 = vmul.f32 %v84_v28, %v76_v22  ;;  %v86_v30 = vpop.eup %85 }
  0x26   :  { %v50_v31 = vmul.f32 %v86_v30, %v82_v26 }
  0x27   :  { %53 = vst [vmem:[%s140_s2 + $0x10] sm:$0xff] %v49_v29 }
  0x28   :  { %54 = vst [vmem:[%s140_s2 + $0x18] sm:$0xff] %v50_v31 }

// kernel: nac_forward.3
= control target key start
LH: loop header
LB: loop body
LE: loop exit
PB: predicated region body
PF: predicated region fallthrough
CT: control target
= control target key end

     0   :  { %vm17_vm0 = vcmask 261120   ;;  %v642_v3 = vmov 0.0   ;;  %vm643_vm1 = vmmov 0   ;;  %s744_s0 = inlined_call_operand.vmem [shape: f32[8,32], index: 0, kind: input, shape index: {}]   ;;  %s745_s1 = inlined_call_operand.vmem [shape: f32[32,128], index: 1, kind: input, shape index: {}]   ;;  %s746_s2 = inlined_call_operand.hbm [shape: f32[8,128], index: 2, kind: output, shape index: {}]  }
   0x1   :  { %v15_v0 = vld [vmem:[%s745_s1 + $0x18] sm:$0xff]  ;;  %v14_v1 = vld [vmem:[%s745_s1 + $0x10] sm:$0xff]  ;;  %v13_v2 = vld [vmem:[%s745_s1 + $0x8] sm:$0xff]  ;;  %551 = vmatprep.subr.mxu0 %v642_v3  ;;  %562 = vmatprep.subr.mxu1 %v642_v3 }
   0x2   :  { %v670_v4 = vand.u32 4294901760, %v15_v0  ;;  %v672_v5 = vand.u32 4294901760, %v14_v1  ;;  %v674_v6 = vand.u32 4294901760, %v13_v2  ;;  %v12_v7 = vld [vmem:[%s745_s1] sm:$0xff]  ;;  %559 = vmatprep.mubr.msk.f32.mxu0 %vm643_vm1, %v642_v3  ;;  %570 = vmatprep.mubr.msk.f32.mxu1 %vm643_vm1, %v642_v3 }
   0x3   :  { %v16_v8 = vld [vmem:[%s744_s0] sm:$0xff]  ;;  %v683_v9 = vand.u32 4294901760, %v12_v7 }
   0x4   :  { %v19_v10 = vsel %vm17_vm0, %v16_v8, 0 }
   0x5   :  { %7 = vsyncpa [#allocation3], 0  ;;  %552 = vmatpush3.msra.mxu0 %v670_v4  ;;  %v126_v11 = vsub.f32 %v15_v0, %v670_v4  ;;  %v691_v12 = vand.u32 4294901760, %v19_v10  ;;  %v133_v13 = vsub.f32 %v14_v1, %v672_v5  ;;  %v140_v14 = vsub.f32 %v13_v2, %v674_v6  ;;  %s644_s0 = smov [#allocation2]  }
   0x6   :  { %553 = vmatprep.subr.mxu0 %v642_v3  ;;  %v147_v15 = vsub.f32 %v12_v7, %v683_v9  ;;  %s513_s1 = sshll.u32 %s644_s0, 4  ;;  %s514_s1 = int_to_ptr.vmem [resolvable:$true] %s513_s1 }
   0x7   :  { %554 = vmatpush3.msra.mxu0 %v672_v5  ;;  %v127_v16 = vand.u32 4294901760, %v126_v11  ;;  %v91_v17 = vsub.f32 %v19_v10, %v691_v12  ;;  %v134_v18 = vand.u32 4294901760, %v133_v13  ;;  %v141_v19 = vand.u32 4294901760, %v140_v14  ;;  %s620_s19 = scalar_lea.vmem %s514_s1, 128  ;;  %p625_p1 = scmp.lt.s32.totalorder %s514_s1, %s514_s1 }
   0x8   :  { %555 = vmatprep.subr.mxu0 %v642_v3  ;;  %v148_v20 = vand.u32 4294901760, %v147_v15  ;;  %p621_p0 = scmp.ne.s32.totalorder %s514_s1, %s620_s19  ;;  %p626_p2 = scmp.lt.s32.totalorder %s620_s19, %s620_s19 }
   0x9   :  { %556 = vmatpush3.msra.mxu0 %v674_v6  ;;  %v128_v21 = vsub.f32 %v126_v11, %v127_v16  ;;  %v92_v22 = vand.u32 4294901760, %v91_v17  ;;  %v135_v23 = vsub.f32 %v133_v13, %v134_v18  ;;  %v142_v24 = vsub.f32 %v140_v14, %v141_v19 }
   0xa   :  { %557 = vmatprep.subr.mxu0 %v642_v3  ;;  %v149_v28 = vsub.f32 %v147_v15, %v148_v20  ;;  %p627_p3 = por %p626_p2, %p625_p1 }
   0xb   :  { %558 = vmatpush3.msra.mxu0 %v683_v9  ;;  %v129_v25 = vand.u32 4294901760, %v128_v21  ;;  %v93_v26 = vsub.f32 %v91_v17, %v92_v22  ;;  %v136_v27 = vand.u32 4294901760, %v135_v23  ;;  %v143_v30 = vand.u32 4294901760, %v142_v24 }
   0xc   :  { %573 = vmatprep.subr.mxu0 %v642_v3  ;;  %v150_v31 = vand.u32 4294901760, %v149_v28  ;;  %p628_p4 = pnand %p627_p3, %p621_p0 }
   0xd   :  { %563 = vmatpush3.msra.mxu1 %v129_v25  ;;  %v94_v29 = vand.u32 4294901760, %v93_v26 }
   0xe   :  { %564 = vmatprep.subr.mxu1 %v642_v3 }
   0xf   :  { %560 = vmatmul.mubr.f32.vlgmr.msra.gmra.mxu0 %v94_v29  ;;  %565 = vmatpush3.msra.mxu1 %v136_v27 }
  0x10   :  { %574 = vmatpush3.msra.mxu0 %v126_v11  ;;  %566 = vmatprep.subr.mxu1 %v642_v3 }
  0x11   :  { %575 = vmatprep.subr.mxu0 %v642_v3  ;;  %567 = vmatpush3.msra.mxu1 %v143_v30 }
  0x12   :  { %576 = vmatpush3.msra.mxu0 %v133_v13  ;;  %568 = vmatprep.subr.mxu1 %v642_v3 }
  0x13   :  { %577 = vmatprep.subr.mxu0 %v642_v3  ;;  %569 = vmatpush3.msra.mxu1 %v150_v31 }
  0x14   :  { %578 = vmatpush3.msra.mxu0 %v140_v14  ;;  %571 = vmatmul.mubr.f32.vlgmr.msra.gmra.mxu1 %v691_v12 }
  0x15   :  { %579 = vmatprep.subr.mxu0 %v642_v3  ;;  %584 = vmatprep.subr.mxu1 %v642_v3 }
  0x16   :  { %580 = vmatpush3.msra.mxu0 %v147_v15  ;;  %581 = vmatprep.mubr.msk.f32.mxu0 %vm643_vm1, %v642_v3 }
  0x17   :  { %585 = vmatpush3.msra.mxu1 %v670_v4  ;;  %582 = vmatmul.mubr.f32.vlgmr.msra.gmra.mxu0 %v91_v17 }
  0x18   :  { %586 = vmatprep.subr.mxu1 %v642_v3  ;;  %595 = vmatprep.subr.mxu0 %v642_v3 }
  0x19   :  { %587 = vmatpush3.msra.mxu1 %v672_v5  ;;  %596 = vmatpush3.msra.mxu0 %v127_v16 }
  0x1a   :  { %588 = vmatprep.subr.mxu1 %v642_v3  ;;  %597 = vmatprep.subr.mxu0 %v642_v3 }
  0x1b   :  { %589 = vmatpush3.msra.mxu1 %v674_v6  ;;  %598 = vmatpush3.msra.mxu0 %v134_v18 }
  0x1c   :  { %590 = vmatprep.subr.mxu1 %v642_v3  ;;  %599 = vmatprep.subr.mxu0 %v642_v3 }
  0x1d   :  { %591 = vmatpush3.msra.mxu1 %v683_v9  ;;  %592 = vmatprep.mubr.msk.f32.mxu1 %vm643_vm1, %v642_v3 }
  0x1e   :  { %600 = vmatpush3.msra.mxu0 %v141_v19  ;;  %593 = vmatmul.mubr.f32.vlgmr.msra.gmra.mxu1 %v92_v22 }
  0x1f   :  { %601 = vmatprep.subr.mxu0 %v642_v3  ;;  %606 = vmatprep.subr.mxu1 %v642_v3 }
  0x20   :  { %602 = vmatpush3.msra.mxu0 %v148_v20  ;;  %603 = vmatprep.mubr.msk.f32.mxu0 %vm643_vm1, %v642_v3 }
  0x21   :  { %607 = vmatpush3.msra.mxu1 %v670_v4  ;;  %604 = vmatmul.mubr.f32.vlgmr.msra.gmra.mxu0 %v691_v12 }
  0x22   :  { %608 = vmatprep.subr.mxu1 %v642_v3  ;;  %614 = vmatprep.mubr.msk.f32.mxu1 %vm643_vm1, %v642_v3 }
  0x23   :  { %609 = vmatpush3.msra.mxu1 %v672_v5 }
  0x24   :  { %610 = vmatprep.subr.mxu1 %v642_v3 }
  0x25   :  { %611 = vmatpush3.msra.mxu1 %v674_v6 }
  0x26   :  { %612 = vmatprep.subr.mxu1 %v642_v3 }
  0x27   :  { %613 = vmatpush3.msra.mxu1 %v683_v9 }
  0x28   :  { %615 = vmatmul.mubr.f32.vlgmr.msra.gmra.mxu1 %v691_v12 }
  0xcf   :  { %v96_v32 = vpop.f32.mrf.mxu0 }
  0xd1   :  { %v561_v33 = vpop.f32.mrf.mxu0 }
  0xd4   :  { %v187_v34 = vpop.f32.mrf.mxu1 }
  0xd5   :  { %v188_v38 = vadd.f32 %v187_v34, %v96_v32 }
  0xd6   :  { %v572_v35 = vpop.f32.mrf.mxu1 }
  0xd7   :  { %v267_v36 = vpop.f32.mrf.mxu0 }
  0xd8   :  { %v268_v41 = vadd.f32 %v267_v36, %v188_v38 }
  0xd9   :  { %v583_v37 = vpop.f32.mrf.mxu0 }
  0xde   :  { %v344_v39 = vpop.f32.mrf.mxu1 }
  0xdf   :  { %v345_v43 = vadd.f32 %v344_v39, %v268_v41 }
  0xe0   :  { %v594_v40 = vpop.f32.mrf.mxu1 }
  0xe1   :  { %v427_v42 = vpop.f32.mrf.mxu0 }
  0xe2   :  { %v428_v45 = vadd.f32 %v427_v42, %v345_v43 }
  0xe3   :  { %v605_v44 = vpop.f32.mrf.mxu0 }
  0xe8   :  { %v502_v46 = vpop.f32.mrf.mxu1 }
  0xe9   :  { %v503_v47 = vadd.f32 %v502_v46, %v428_v45 }
  0xea   :  { %v616_v48 = vpop.f32.mrf.mxu1 }
  0xeb   :  { %506 = vst [vmem:[#allocation2] sm:$0xff] %v503_v47 }
  0xec   :  { %631 = shalt.err (!%p628_p4)
}
  0xed   :  { %516 = dma.vmem_to_hbm [thread:$0]  %s514_s1, 128, %s746_s2, [#allocation3]  }
  0xee   :  { %640 = dma.done.wait [#allocation3], 128  }
  0xef   :  { %641 = vsyncadd [#allocation3], 4294967168 }
  0xf0   :  { %520 = vsyncpa [#allocation3], 1 }

</bundles_post_ra>
